<compile_context>
chip_gen: v5e
topology: v5e:2x2
jax: 0.10.0
libtpu: 0.0.40
codegen_flags: <defaults>
</compile_context>

<pallas_src>
import jax
import jax.numpy as jnp
from jax.experimental import pallas as pl
from jax.experimental.pallas import tpu as pltpu


K_IN = 28 * 28          # 784 (full last dim of x — no lane padding needed)
H1 = 128
H2 = 64
N_OUT = 10
N_PAD = 128             # lane-dense logits slab
MAX_TILE_B = 2048       # ~14 MiB total VMEM with f32 x input: safe on v7x too


def _round_up(x, m):
    return ((x + m - 1) // m) * m


def mlp_kernel(x_ref, w1_ref, b1_ref, w2_ref, b2_ref, w3_ref, b3_ref, out_ref):
    # x_ref : (TILE_B, 784) f32      w1: (784, 128) bf16    b1: (1, 128) f32
    # w2    : (128, 64)     bf16     b2: (1, 64)    f32
    # w3    : (64, 128)     bf16     b3: (1, 128)   f32 (cols >= 10 are zero)
    # out   : (TILE_B, 128) bf16
    x = x_ref[...].astype(jnp.bfloat16)        # cast in-kernel: x read once as f32

    # Layer 1: bf16 MXU matmul, f32 accumulate; bias/ReLU in f32.
    h1 = jnp.dot(x, w1_ref[...], preferred_element_type=jnp.float32) + b1_ref[...]
    h1 = jnp.maximum(h1, 0.0)

    # Layer 2.
    h2 = jnp.dot(h1.astype(jnp.bfloat16), w2_ref[...],
                 preferred_element_type=jnp.float32) + b2_ref[...]
    h2 = jnp.maximum(h2, 0.0)

    # Layer 3 (lane-padded to 128 outputs -> unmasked stores), bf16 writeback.
    out = jnp.dot(h2.astype(jnp.bfloat16), w3_ref[...],
                  preferred_element_type=jnp.float32) + b3_ref[...]
    out_ref[...] = out.astype(out_ref.dtype)


def prepare_params(params):
    """One-time parameter prep (hoisted out of the per-call forward):
    bf16 casts + zero-padding of the final layer to 128 output lanes."""
    w1, b1, w2, b2, w3, b3 = params           # w: (in, out) f32, b: (1, out) f32
    w1_b = w1.astype(jnp.bfloat16)                                   # (784, 128)
    w2_b = w2.astype(jnp.bfloat16)                                   # (128, 64)
    w3_p = jnp.pad(w3, ((0, 0), (0, N_PAD - N_OUT))).astype(jnp.bfloat16)  # (64,128)
    b3_p = jnp.pad(b3, ((0, 0), (0, N_PAD - N_OUT)))                 # (1, 128) f32
    return (w1_b, b1, w2_b, b2, w3_p, b3_p)


def _pick_tile(b_pad16):
    """Pick TILE_B: biggest tile within VMEM budget, but keep >=2 grid steps
    when the batch allows it (DMA pipelining + v7x dual-TensorCore sharding)."""
    if b_pad16 <= 16:
        return b_pad16
    if b_pad16 <= 2 * MAX_TILE_B:
        return _round_up(pl.cdiv(b_pad16, 2), 16)
    return MAX_TILE_B


def mlp_mnist_forward(x_nchw, prepped_params):
    """x_nchw: (B, 1, 28, 28) float32. Returns logits (B, 10) float32."""
    w1_b, b1, w2_b, b2, w3_p, b3_p = prepped_params
    B = x_nchw.shape[0]

    # nn.Flatten on NCHW -> (B, 784); stays f32 (cast happens in-kernel).
    x_flat = x_nchw.reshape(B, K_IN)

    TILE_B = _pick_tile(_round_up(B, 16))
    B_pad = _round_up(B, TILE_B)
    if B_pad != B:
        x_flat = jnp.pad(x_flat, ((0, B_pad - B), (0, 0)))

    grid = (B_pad // TILE_B,)

    def resident(shape):
        return pl.BlockSpec(shape, lambda i: (0, 0))

    flops = 2 * B_pad * (K_IN * H1 + H1 * H2 + H2 * N_PAD)
    bytes_accessed = (x_flat.size * 4
                      + w1_b.size * 2 + w2_b.size * 2 + w3_p.size * 2
                      + b1.size * 4 + b2.size * 4 + b3_p.size * 4
                      + B_pad * N_PAD * 2)

    out = pl.pallas_call(
        mlp_kernel,
        out_shape=jax.ShapeDtypeStruct((B_pad, N_PAD), jnp.bfloat16),
        grid=grid,
        in_specs=[
            pl.BlockSpec((TILE_B, K_IN), lambda i: (i, 0)),    # x: row-tiled, f32
            resident((K_IN, H1)), resident((1, H1)),           # w1, b1 (resident)
            resident((H1, H2)),   resident((1, H2)),           # w2, b2
            resident((H2, N_PAD)), resident((1, N_PAD)),       # w3, b3
        ],
        out_specs=pl.BlockSpec((TILE_B, N_PAD), lambda i: (i, 0)),
        compiler_params=pltpu.CompilerParams(
            dimension_semantics=("parallel",),
            vmem_limit_bytes=32 * 1024 * 1024,
        ),
        cost_estimate=pl.CostEstimate(
            flops=flops, transcendentals=0, bytes_accessed=bytes_accessed),
    )(x_flat, w1_b, b1, w2_b, b2, w3_p, b3_p)

    # Strip batch + lane padding; return f32 logits.
    return out[:B, :N_OUT].astype(jnp.float32)


def init_params(key):
    """Deterministic init mimicking nn.Linear's uniform(-1/sqrt(fan_in), 1/sqrt(fan_in)).
    Weights stored as (in_features, out_features) — i.e. PyTorch W.T."""
    dims = [(K_IN, H1), (H1, H2), (H2, N_OUT)]
    params = []
    for (fan_in, fan_out) in dims:
        key, kw, kb = jax.random.split(key, 3)
        bound = 1.0 / jnp.sqrt(fan_in)
        w = jax.random.uniform(kw, (fan_in, fan_out), jnp.float32, -bound, bound)
        b = jax.random.uniform(kb, (1, fan_out), jnp.float32, -bound, bound)
        params += [w, b]
    return tuple(params)


def reference_forward(x_nchw, params):
    """Matches the kernel's numerics: bf16 matmul operands, f32 accumulate."""
    w1, b1, w2, b2, w3, b3 = params
    x = x_nchw.reshape(x_nchw.shape[0], -1).astype(jnp.bfloat16)
    h1 = jnp.maximum(
        jnp.dot(x, w1.astype(jnp.bfloat16), preferred_element_type=jnp.float32) + b1, 0.0)
    h2 = jnp.maximum(
        jnp.dot(h1.astype(jnp.bfloat16), w2.astype(jnp.bfloat16),
                preferred_element_type=jnp.float32) + b2, 0.0)
    return jnp.dot(h2.astype(jnp.bfloat16), w3.astype(jnp.bfloat16),
                   preferred_element_type=jnp.float32) + b3


if __name__ == "__main__":
    key = jax.random.PRNGKey(0)
    key, kx = jax.random.split(key)

    B = 8  # small MNIST-style batch
    x = jax.random.normal(kx, (B, 1, 28, 28), jnp.float32)

    params = init_params(key)
    prepped = prepare_params(params)   # one-time weight pad/cast (not per call)

    logits = mlp_mnist_forward(x, prepped)
    logits = jax.block_until_ready(logits)

    ref = reference_forward(x, params)
    assert logits.shape == (B, N_OUT)
    # Output slab is bf16 (f32 accumulation in-kernel) -> loosened tolerance.
    assert jnp.allclose(logits, ref, atol=2e-2, rtol=2e-2), "mismatch vs reference"

    print("KERNEL_OK")
</pallas_src>

<mosaic_0001>
module attributes {stable_mosaic.version = 11 : i64} {
  func.func @mlp_kernel(%arg0: i32, %arg1: memref<16x784xf32, #tpu.memory_space<vmem>>, %arg2: memref<784x128xbf16, #tpu.memory_space<vmem>>, %arg3: memref<1x128xf32, #tpu.memory_space<vmem>>, %arg4: memref<128x64xbf16, #tpu.memory_space<vmem>>, %arg5: memref<1x64xf32, #tpu.memory_space<vmem>>, %arg6: memref<64x128xbf16, #tpu.memory_space<vmem>>, %arg7: memref<1x128xf32, #tpu.memory_space<vmem>>, %arg8: memref<16x128xbf16, #tpu.memory_space<vmem>>) attributes {dimension_semantics = [#tpu.dimension_semantics<parallel>], iteration_bounds = array<i64: 1>, scalar_prefetch = 0 : i64, scratch_operands = 0 : i64, tpu.core_type = #tpu.core_type<tc>, window_params = [{transform_indices = @transform_0, window_bounds = array<i64: 16, 784>}, {pipeline_mode = #tpu.pipeline_mode<synchronous>, transform_indices = @transform_1, window_bounds = array<i64: 784, 128>}, {pipeline_mode = #tpu.pipeline_mode<synchronous>, transform_indices = @transform_2, window_bounds = array<i64: 1, 128>}, {pipeline_mode = #tpu.pipeline_mode<synchronous>, transform_indices = @transform_3, window_bounds = array<i64: 128, 64>}, {pipeline_mode = #tpu.pipeline_mode<synchronous>, transform_indices = @transform_4, window_bounds = array<i64: 1, 64>}, {pipeline_mode = #tpu.pipeline_mode<synchronous>, transform_indices = @transform_5, window_bounds = array<i64: 64, 128>}, {pipeline_mode = #tpu.pipeline_mode<synchronous>, transform_indices = @transform_6, window_bounds = array<i64: 1, 128>}, {transform_indices = @transform_7, window_bounds = array<i64: 16, 128>}]} {
    %c0 = arith.constant 0 : index
    %c0_0 = arith.constant 0 : index
    %0 = vector.load %arg1[%c0, %c0_0] : memref<16x784xf32, #tpu.memory_space<vmem>>, vector<16x784xf32>
    %1 = arith.truncf %0 : vector<16x784xf32> to vector<16x784xbf16>
    %c0_1 = arith.constant 0 : index
    %c0_2 = arith.constant 0 : index
    %2 = vector.load %arg2[%c0_1, %c0_2] : memref<784x128xbf16, #tpu.memory_space<vmem>>, vector<784x128xbf16>
    %cst = arith.constant dense<0.000000e+00> : vector<16x128xf32>
    %3 = tpu.matmul %1, %2, %cst {dimension_numbers = #tpu.dot_dimension_numbers<[1], [0], [0], [1], [0, 0, 1, 1], [], []>} : vector<16x784xbf16>, vector<784x128xbf16>, vector<16x128xf32> -> vector<16x128xf32>
    %c0_3 = arith.constant 0 : index
    %c0_4 = arith.constant 0 : index
    %4 = vector.load %arg3[%c0_3, %c0_4] : memref<1x128xf32, #tpu.memory_space<vmem>>, vector<1x128xf32>
    %5 = vector.broadcast %4 : vector<1x128xf32> to vector<16x128xf32>
    %6 = arith.addf %3, %5 : vector<16x128xf32>
    %cst_5 = arith.constant 0.000000e+00 : f32
    %7 = vector.broadcast %cst_5 : f32 to vector<16x128xf32>
    %8 = arith.maximumf %6, %7 : vector<16x128xf32>
    %9 = arith.truncf %8 : vector<16x128xf32> to vector<16x128xbf16>
    %c0_6 = arith.constant 0 : index
    %c0_7 = arith.constant 0 : index
    %10 = vector.load %arg4[%c0_6, %c0_7] : memref<128x64xbf16, #tpu.memory_space<vmem>>, vector<128x64xbf16>
    %cst_8 = arith.constant dense<0.000000e+00> : vector<16x64xf32>
    %11 = tpu.matmul %9, %10, %cst_8 {dimension_numbers = #tpu.dot_dimension_numbers<[1], [0], [0], [1], [0, 0, 1, 1], [], []>} : vector<16x128xbf16>, vector<128x64xbf16>, vector<16x64xf32> -> vector<16x64xf32>
    %c0_9 = arith.constant 0 : index
    %c0_10 = arith.constant 0 : index
    %12 = vector.load %arg5[%c0_9, %c0_10] : memref<1x64xf32, #tpu.memory_space<vmem>>, vector<1x64xf32>
    %13 = vector.broadcast %12 : vector<1x64xf32> to vector<16x64xf32>
    %14 = arith.addf %11, %13 : vector<16x64xf32>
    %cst_11 = arith.constant 0.000000e+00 : f32
    %15 = vector.broadcast %cst_11 : f32 to vector<16x64xf32>
    %16 = arith.maximumf %14, %15 : vector<16x64xf32>
    %17 = arith.truncf %16 : vector<16x64xf32> to vector<16x64xbf16>
    %c0_12 = arith.constant 0 : index
    %c0_13 = arith.constant 0 : index
    %18 = vector.load %arg6[%c0_12, %c0_13] : memref<64x128xbf16, #tpu.memory_space<vmem>>, vector<64x128xbf16>
    %cst_14 = arith.constant dense<0.000000e+00> : vector<16x128xf32>
    %19 = tpu.matmul %17, %18, %cst_14 {dimension_numbers = #tpu.dot_dimension_numbers<[1], [0], [0], [1], [0, 0, 1, 1], [], []>} : vector<16x64xbf16>, vector<64x128xbf16>, vector<16x128xf32> -> vector<16x128xf32>
    %c0_15 = arith.constant 0 : index
    %c0_16 = arith.constant 0 : index
    %20 = vector.load %arg7[%c0_15, %c0_16] : memref<1x128xf32, #tpu.memory_space<vmem>>, vector<1x128xf32>
    %21 = vector.broadcast %20 : vector<1x128xf32> to vector<16x128xf32>
    %22 = arith.addf %19, %21 : vector<16x128xf32>
    %23 = arith.truncf %22 : vector<16x128xf32> to vector<16x128xbf16>
    %c0_17 = arith.constant 0 : index
    %c0_18 = arith.constant 0 : index
    %24 = vector.load %arg8[%c0_17, %c0_18] : memref<16x128xbf16, #tpu.memory_space<vmem>>, vector<16x128xbf16>
    tpu.vector_store %arg8[%c0_17, %c0_18], %23 {strides = array<i32>} : memref<16x128xbf16, #tpu.memory_space<vmem>>, vector<16x128xbf16>,
    return
  }
  func.func @transform_0(%arg0: i32) -> (i32, i32) {
    %c0_i32 = arith.constant 0 : i32
    %c0_i32_0 = arith.constant 0 : i32
    return %arg0, %c0_i32 : i32, i32
  }
  func.func @transform_1(%arg0: i32) -> (i32, i32) {
    %c0_i32 = arith.constant 0 : i32
    %c0_i32_0 = arith.constant 0 : i32
    %c0_i32_1 = arith.constant 0 : i32
    return %c0_i32, %c0_i32_0 : i32, i32
  }
  func.func @transform_2(%arg0: i32) -> (i32, i32) {
    %c0_i32 = arith.constant 0 : i32
    %c0_i32_0 = arith.constant 0 : i32
    %c0_i32_1 = arith.constant 0 : i32
    return %c0_i32, %c0_i32_0 : i32, i32
  }
  func.func @transform_3(%arg0: i32) -> (i32, i32) {
    %c0_i32 = arith.constant 0 : i32
    %c0_i32_0 = arith.constant 0 : i32
    %c0_i32_1 = arith.constant 0 : i32
    return %c0_i32, %c0_i32_0 : i32, i32
  }
  func.func @transform_4(%arg0: i32) -> (i32, i32) {
    %c0_i32 = arith.constant 0 : i32
    %c0_i32_0 = arith.constant 0 : i32
    %c0_i32_1 = arith.constant 0 : i32
    return %c0_i32, %c0_i32_0 : i32, i32
  }
  func.func @transform_5(%arg0: i32) -> (i32, i32) {
    %c0_i32 = arith.constant 0 : i32
    %c0_i32_0 = arith.constant 0 : i32
    %c0_i32_1 = arith.constant 0 : i32
    return %c0_i32, %c0_i32_0 : i32, i32
  }
  func.func @transform_6(%arg0: i32) -> (i32, i32) {
    %c0_i32 = arith.constant 0 : i32
    %c0_i32_0 = arith.constant 0 : i32
    %c0_i32_1 = arith.constant 0 : i32
    return %c0_i32, %c0_i32_0 : i32, i32
  }
  func.func @transform_7(%arg0: i32) -> (i32, i32) {
    %c0_i32 = arith.constant 0 : i32
    %c0_i32_0 = arith.constant 0 : i32
    return %arg0, %c0_i32 : i32, i32
  }
}

</mosaic_0001>

<bundles_post_ra>
// kernel: tpu_custom_call.1
= control target key start
LH: loop header
LB: loop body
LE: loop exit
PB: predicated region body
PF: predicated region fallthrough
CT: control target
= control target key end

     0   :  { %12 = vsyncpa [#allocation3], 0  ;;  %s1252_s0 = inlined_call_operand.hbm [shape: f32[16,784], index: 0, kind: input, shape index: {}]   ;;  %s1253_s1 = inlined_call_operand.hbm [shape: bf16[784,128], index: 1, kind: input, shape index: {}]   ;;  %s1254_s2 = inlined_call_operand.vmem [shape: f32[1,128], index: 2, kind: input, shape index: {}]   ;;  %s1255_s3 = inlined_call_operand.vmem [shape: bf16[128,64], index: 3, kind: input, shape index: {}]   ;;  %s1256_s4 = inlined_call_operand.vmem [shape: f32[1,64], index: 4, kind: input, shape index: {}]   ;;  %s1257_s5 = inlined_call_operand.vmem [shape: bf16[64,128], index: 5, kind: input, shape index: {}]   ;;  %s1258_s6 = inlined_call_operand.vmem [shape: f32[1,128], index: 6, kind: input, shape index: {}]   ;;  %s1259_s7 = inlined_call_operand.hbm [shape: bf16[16,128], index: 7, kind: output, shape index: {}]  }
   0x1   :  { %13 = vsyncpa [#allocation6], 0 }
   0x2   :  { %14 = vsyncpa [#allocation4], 0  ;;  %s19_s26 = sshll.u32 %s1252_s0, 4  ;;  %s1145_s27 = smov [#allocation2]   ;;  %s20_s26 = int_to_ptr.hbm [resolvable:$true] %s19_s26 }
   0x3   :  { %s21_s28 = sshll.u32 %s1145_s27, 4  ;;  %s32_s8 = sshll.u32 %s1253_s1, 4  ;;  %s22_s28 = int_to_ptr.vmem [resolvable:$true] %s21_s28  ;;  %s33_s8 = int_to_ptr.hbm [resolvable:$true] %s32_s8 }
   0x4   :  { %s1146_s9 = smov 896   ;;  %s1147_s10 = smov 56  }
   0x5   :  { %27 = dma.hbm_to_vmem [thread:$0]  %s20_s26, 1792, %s22_s28, [#allocation3], %s1146_s9, %s1146_s9, %s1147_s10  }
   0x6   :  { %s1148_s11 = smov [#allocation5]   ;;  %s1149_s13 = smov 64  }
   0x7   :  { %s34_s12 = sshll.u32 %s1148_s11, 4  ;;  %s1150_s14 = smov 4   ;;  %s35_s12 = int_to_ptr.vmem [resolvable:$true] %s34_s12 }
   0x8   :  { %40 = dma.hbm_to_vmem [thread:$0]  %s33_s8, 6272, %s35_s12, [#allocation6], %s1149_s13, %s1149_s13, %s1150_s14  }
   0x9   :  { %1139 = dma.done.wait [#allocation3], 1792  }
   0xa   :  { %1140 = vsyncadd [#allocation3], 4294965504 }
   0xb   :  { %1141 = dma.done.wait [#allocation6], 6272  }
   0xc   :  { %1142 = vsyncadd [#allocation6], 4294961024  ;;  %v998_v0 = vld [vmem:[#allocation5 + $0x38] sm:$0xff]  ;;  %v997_v4 = vld [vmem:[#allocation5 + $0x30] sm:$0xff]  ;;  %vm477_vm0 = vcmask 130048   ;;  %vm703_vm1 = vcmask 523264  }
   0xd   :  { %v1006_v1 = vld [vmem:[#allocation5 + $0x78] sm:$0xff]  ;;  %481 = vmatpush.bf16.msra.mxu0 %v998_v0  ;;  %v1005_v5 = vld [vmem:[#allocation5 + $0x70] sm:$0xff]  ;;  %v996_v8 = vld [vmem:[#allocation5 + $0x28] sm:$0xff] }
   0xe   :  { %v1014_v2 = vld [vmem:[#allocation5 + $0xb8] sm:$0xff]  ;;  %495 = vmatpush.bf16.msra.mxu1 %v1006_v1  ;;  %v1013_v6 = vld [vmem:[#allocation5 + $0xb0] sm:$0xff]  ;;  %v1004_v9 = vld [vmem:[#allocation5 + $0x68] sm:$0xff] }
   0xf   :  { %v1022_v3 = vld [vmem:[#allocation5 + $0xf8] sm:$0xff]  ;;  %509 = vmatpush.bf16.msra.mxu2 %v1014_v2  ;;  %v1021_v7 = vld [vmem:[#allocation5 + $0xf0] sm:$0xff]  ;;  %v1012_v10 = vld [vmem:[#allocation5 + $0xa8] sm:$0xff] }
  0x10   :  { %523 = vmatpush.bf16.msra.mxu3 %v1022_v3  ;;  %v1020_v11 = vld [vmem:[#allocation5 + $0xe8] sm:$0xff]  ;;  %v995_v12 = vld [vmem:[#allocation5 + $0x20] sm:$0xff]  ;;  %v994_v16 = vld [vmem:[#allocation5 + $0x18] sm:$0xff] }
  0x11   :  { %482 = vmatpush.bf16.msra.mxu0 %v997_v4  ;;  %v1003_v13 = vld [vmem:[#allocation5 + $0x60] sm:$0xff]  ;;  %v1002_v17 = vld [vmem:[#allocation5 + $0x58] sm:$0xff]  ;;  %v993_v20 = vld [vmem:[#allocation5 + $0x10] sm:$0xff] }
  0x12   :  { %496 = vmatpush.bf16.msra.mxu1 %v1005_v5  ;;  %v1011_v14 = vld [vmem:[#allocation5 + $0xa0] sm:$0xff]  ;;  %v1010_v18 = vld [vmem:[#allocation5 + $0x98] sm:$0xff]  ;;  %v1001_v21 = vld [vmem:[#allocation5 + $0x50] sm:$0xff] }
  0x13   :  { %510 = vmatpush.bf16.msra.mxu2 %v1013_v6  ;;  %v1019_v15 = vld [vmem:[#allocation5 + $0xe0] sm:$0xff]  ;;  %v1018_v19 = vld [vmem:[#allocation5 + $0xd8] sm:$0xff]  ;;  %v1009_v22 = vld [vmem:[#allocation5 + $0x90] sm:$0xff] }
  0x14   :  { %524 = vmatpush.bf16.msra.mxu3 %v1021_v7  ;;  %v1017_v23 = vld [vmem:[#allocation5 + $0xd0] sm:$0xff]  ;;  %v992_v24 = vld [vmem:[#allocation5 + $0x8] sm:$0xff]  ;;  %v991_v28 = vld [vmem:[#allocation5] sm:$0xff] }
  0x15   :  { %483 = vmatpush.bf16.msra.mxu0 %v996_v8  ;;  %v1000_v25 = vld [vmem:[#allocation5 + $0x48] sm:$0xff]  ;;  %v999_v29 = vld [vmem:[#allocation5 + $0x40] sm:$0xff]  ;;  %v60_v30 = vld [vmem:[#allocation2] sm:$0xff] }
  0x16   :  { %497 = vmatpush.bf16.msra.mxu1 %v1004_v9  ;;  %v1008_v26 = vld [vmem:[#allocation5 + $0x88] sm:$0xff]  ;;  %v61_v32 = vld [vmem:[#allocation2 + $0x8] sm:$0xff]  ;;  %v68_v33 = vld [vmem:[#allocation2 + $0x40] sm:$0xff] }
  0x17   :  { %511 = vmatpush.bf16.msra.mxu2 %v1012_v10  ;;  %v1016_v27 = vld [vmem:[#allocation5 + $0xc8] sm:$0xff]  ;;  %v1030_v34 = vld [vmem:[#allocation5 + $0x138] sm:$0xff]  ;;  %v1007_v36 = vld [vmem:[#allocation5 + $0x80] sm:$0xff]  ;;  %v75_v43 = vpack.c.bf16 %v68_v33, %v61_v32 }
  0x18   :  { %525 = vmatpush.bf16.msra.mxu3 %v1020_v11  ;;  %v67_v31 = vld [vmem:[#allocation2 + $0x38] sm:$0xff]  ;;  %v1038_v35 = vld [vmem:[#allocation5 + $0x178] sm:$0xff]  ;;  %v1015_v37 = vld [vmem:[#allocation5 + $0xc0] sm:$0xff] }
  0x19   :  { %484 = vmatpush.bf16.msra.mxu0 %v995_v12  ;;  %v62_v38 = vld [vmem:[#allocation2 + $0x10] sm:$0xff]  ;;  %v69_v39 = vld [vmem:[#allocation2 + $0x48] sm:$0xff]  ;;  %v74_v40 = vpack.c.bf16 %v67_v31, %v60_v30  ;;  %v63_v41 = vld [vmem:[#allocation2 + $0x18] sm:$0xff] }
  0x1a   :  { %498 = vmatpush.bf16.msra.mxu1 %v1003_v13  ;;  %v70_v42 = vld [vmem:[#allocation2 + $0x50] sm:$0xff]  ;;  %v1029_v45 = vld [vmem:[#allocation5 + $0x130] sm:$0xff]  ;;  %v76_v47 = vpack.c.bf16 %v69_v39, %v62_v38  ;;  %v1028_v49 = vld [vmem:[#allocation5 + $0x128] sm:$0xff] }
  0x1b   :  { %512 = vmatpush.bf16.msra.mxu2 %v1011_v14  ;;  %v1039_v44 = vld [vmem:[#allocation5 + $0x180] sm:$0xff]  ;;  %v1037_v46 = vld [vmem:[#allocation5 + $0x170] sm:$0xff]  ;;  %v77_v48 = vpack.c.bf16 %v70_v42, %v63_v41  ;;  %v1036_v50 = vld [vmem:[#allocation5 + $0x168] sm:$0xff] }
  0x1c   :  { %526 = vmatpush.bf16.msra.mxu3 %v1019_v15  ;;  %v1027_v51 = vld [vmem:[#allocation5 + $0x120] sm:$0xff]  ;;  %v1026_v53 = vld [vmem:[#allocation5 + $0x118] sm:$0xff]  ;;  %v1025_v57 = vld [vmem:[#allocation5 + $0x110] sm:$0xff] }
  0x1d   :  { %485 = vmatpush.bf16.msra.mxu0 %v994_v16  ;;  %v1035_v52 = vld [vmem:[#allocation5 + $0x160] sm:$0xff]  ;;  %v1034_v54 = vld [vmem:[#allocation5 + $0x158] sm:$0xff]  ;;  %v1033_v58 = vld [vmem:[#allocation5 + $0x150] sm:$0xff] }
  0x1e   :  { %499 = vmatpush.bf16.msra.mxu1 %v1002_v17  ;;  %v66_v55 = vld [vmem:[#allocation2 + $0x30] sm:$0xff]  ;;  %v73_v56 = vld [vmem:[#allocation2 + $0x68] sm:$0xff]  ;;  %v1024_v60 = vld [vmem:[#allocation5 + $0x108] sm:$0xff] }
  0x1f   :  { %513 = vmatpush.bf16.msra.mxu2 %v1010_v18  ;;  %v80_v59 = vpack.c.bf16 %v73_v56, %v66_v55  ;;  %v1032_v61 = vld [vmem:[#allocation5 + $0x148] sm:$0xff]  ;;  %v1023_v62 = vld [vmem:[#allocation5 + $0x100] sm:$0xff]  ;;  %v64_v0 = vld [vmem:[#allocation2 + $0x20] sm:$0xff] }
  0x20   :  { %527 = vmatpush.bf16.msra.mxu3 %v1018_v19  ;;  %v1031_v63 = vld [vmem:[#allocation5 + $0x140] sm:$0xff]  ;;  %v71_v1 = vld [vmem:[#allocation2 + $0x58] sm:$0xff]  ;;  %v65_v2 = vld [vmem:[#allocation2 + $0x28] sm:$0xff] }
  0x21   :  { %486 = vmatpush.bf16.msra.mxu0 %v993_v20  ;;  %v72_v3 = vld [vmem:[#allocation2 + $0x60] sm:$0xff]  ;;  %v78_v4 = vpack.c.bf16 %v71_v1, %v64_v0  ;;  %v1047_v6 = vld [vmem:[%s1255_s3 + $0x38] sm:$0xff]  ;;  %v1046_v7 = vld [vmem:[%s1255_s3 + $0x30] sm:$0xff] }
  0x22   :  { %500 = vmatpush.bf16.msra.mxu1 %v1001_v21  ;;  %v79_v5 = vpack.c.bf16 %v72_v3, %v65_v2  ;;  %v1045_v8 = vld [vmem:[%s1255_s3 + $0x28] sm:$0xff]  ;;  %v1044_v9 = vld [vmem:[%s1255_s3 + $0x20] sm:$0xff]  ;;  %v1043_v10 = vld [vmem:[%s1255_s3 + $0x18] sm:$0xff] }
  0x23   :  { %514 = vmatpush.bf16.msra.mxu2 %v1009_v22  ;;  %v1042_v11 = vld [vmem:[%s1255_s3 + $0x10] sm:$0xff]  ;;  %v1041_v12 = vld [vmem:[%s1255_s3 + $0x8] sm:$0xff]  ;;  %v1040_v16 = vld [vmem:[%s1255_s3] sm:$0xff] }
  0x24   :  { %528 = vmatpush.bf16.msra.mxu3 %v1017_v23  ;;  %v1064_v17 = vld [vmem:[%s1254_s2] ss:$0 sm:$0xff]  ;;  %v1051_v18 = vld [vmem:[%s1257_s5 + $0x18] sm:$0xff] }
  0x25   :  { %487 = vmatpush.bf16.msra.mxu0 %v992_v24 }
  0x26   :  { %501 = vmatpush.bf16.msra.mxu1 %v1000_v25 }
  0x27   :  { %515 = vmatpush.bf16.msra.mxu2 %v1008_v26 }
  0x28   :  { %529 = vmatpush.bf16.msra.mxu3 %v1016_v27 }
  0x29   :  { %488 = vmatpush.bf16.msra.mxu0 %v991_v28 }
  0x2a   :  { %502 = vmatpush.bf16.msra.mxu1 %v999_v29 }
  0x2b   :  { %516 = vmatpush.bf16.msra.mxu2 %v1007_v36 }
  0x2c   :  { %530 = vmatpush.bf16.msra.mxu3 %v1015_v37  ;;  %489 = vmatmul.bf16.vlgmr.msra.gmra.mxu0 %v74_v40 }
  0x2d   :  { %537 = vmatpush.bf16.msrb.mxu0 %v1030_v34  ;;  %503 = vmatmul.bf16.vlgmr.msra.gmra.mxu1 %v75_v43 }
  0x2e   :  { %551 = vmatpush.bf16.msrb.mxu1 %v1038_v35  ;;  %517 = vmatmul.bf16.vlgmr.msra.gmra.mxu2 %v76_v47  ;;  %v1050_v47 = vld [vmem:[%s1257_s5 + $0x10] sm:$0xff] }
  0x2f   :  { %572 = vmatpush.bf16.msrb.mxu2 %v1039_v44  ;;  %531 = vmatmul.bf16.vlgmr.msra.gmra.mxu3 %v77_v48  ;;  %v1049_v48 = vld [vmem:[%s1257_s5 + $0x8] sm:$0xff] }
  0x30   :  { %650 = vmatpush.bf16.msrb.mxu3 %v1047_v6 }
  0x31   :  { %538 = vmatpush.bf16.msrb.mxu0 %v1029_v45 }
  0x32   :  { %552 = vmatpush.bf16.msrb.mxu1 %v1037_v46 }
  0x33   :  { %711 = vmatpush.bf16.msra.mxu2 %v1051_v18 }
  0x34   :  { %651 = vmatpush.bf16.msrb.mxu3 %v1046_v7 }
  0x35   :  { %539 = vmatpush.bf16.msrb.mxu0 %v1028_v49  ;;  %v1048_v49 = vld [vmem:[%s1257_s5] sm:$0xff]  ;;  %s1151_s5 = smov [#allocation7]  }
  0x36   :  { %553 = vmatpush.bf16.msrb.mxu1 %v1036_v50  ;;  %s729_s18 = sshll.u32 %s1151_s5, 4  ;;  %s730_s18 = int_to_ptr.vmem [resolvable:$true] %s729_s18 }
  0x37   :  { %712 = vmatpush.bf16.msra.mxu2 %v1050_v47 }
  0x38   :  { %652 = vmatpush.bf16.msrb.mxu3 %v1045_v8 }
  0x39   :  { %540 = vmatpush.bf16.msrb.mxu0 %v1027_v51  ;;  %v1065_v51 = vld [vmem:[%s1256_s4] ss:$0 sm:$0xff]  ;;  %s731_s4 = sshll.u32 %s1259_s7, 4  ;;  %s732_s4 = int_to_ptr.hbm [resolvable:$true] %s731_s4 }
  0x3a   :  { %554 = vmatpush.bf16.msrb.mxu1 %v1035_v52 }
  0x3b   :  { %713 = vmatpush.bf16.msra.mxu2 %v1049_v48 }
  0x3c   :  { %653 = vmatpush.bf16.msrb.mxu3 %v1044_v9 }
  0x3d   :  { %541 = vmatpush.bf16.msrb.mxu0 %v1026_v53 }
  0x3e   :  { %555 = vmatpush.bf16.msrb.mxu1 %v1034_v54  ;;  %941 = vmatmul.msk.bf16.vlgmr.msrb.gmra.mxu2 %vm477_vm0, %v80_v59  ;;  %v1066_v59 = vld [vmem:[%s1258_s6] ss:$0 sm:$0xff] }
  0x3f   :  { %714 = vmatpush.bf16.msra.mxu2 %v1048_v49 }
  0x40   :  { %654 = vmatpush.bf16.msrb.mxu3 %v1043_v10 }
  0x41   :  { %542 = vmatpush.bf16.msrb.mxu0 %v1025_v57 }
  0x42   :  { %556 = vmatpush.bf16.msrb.mxu1 %v1033_v58 }
  0x44   :  { %655 = vmatpush.bf16.msrb.mxu3 %v1042_v11 }
  0x45   :  { %543 = vmatpush.bf16.msrb.mxu0 %v1024_v60 }
  0x46   :  { %557 = vmatpush.bf16.msrb.mxu1 %v1032_v61 }
  0x48   :  { %656 = vmatpush.bf16.msrb.mxu3 %v1041_v12 }
  0x49   :  { %544 = vmatpush.bf16.msrb.mxu0 %v1023_v62 }
  0x4a   :  { %558 = vmatpush.bf16.msrb.mxu1 %v1031_v63 }
  0x4c   :  { %545 = vmatmul.bf16.vlgmr.msrb.gmra.mxu0 %v78_v4  ;;  %657 = vmatpush.bf16.msrb.mxu3 %v1040_v16 }
  0x4d   :  { %559 = vmatmul.bf16.vlgmr.msrb.gmra.mxu1 %v79_v5 }
  0xa9   :  { %v490_v13 = vpop.f32.mrf.mxu0 }
  0xaa   :  { %v504_v14 = vpop.f32.mrf.mxu1  ;;  %v491_v19 = vadd.f32 %v1064_v17, %v490_v13 }
  0xac   :  { %v505_v23 = vadd.f32 %v504_v14, %v491_v19 }
  0xb1   :  { %v518_v15 = vpop.f32.mrf.mxu2  ;;  %v492_v20 = vpop.f32.mrf.mxu0 }
  0xb2   :  { %v506_v21 = vpop.f32.mrf.mxu1  ;;  %v532_v24 = vpop.f32.mrf.mxu3  ;;  %v493_v25 = vadd.f32 %v1064_v17, %v492_v20  ;;  %v519_v26 = vadd.f32 %v518_v15, %v505_v23 }
  0xb4   :  { %v507_v27 = vadd.f32 %v506_v21, %v493_v25  ;;  %v533_v30 = vadd.f32 %v532_v24, %v519_v26 }
  0xb9   :  { %v520_v22 = vpop.f32.mrf.mxu2 }
  0xba   :  { %v521_v32 = vadd.f32 %v520_v22, %v507_v27  ;;  %v534_v34 = vpop.f32.mrf.mxu3 }
  0xbc   :  { %v535_v35 = vadd.f32 %v534_v34, %v521_v32 }
  0xc1   :  { %v574_v31 = vpop.f32.mrf.mxu2 }
  0xc9   :  { %v546_v28 = vpop.f32.mrf.mxu0  ;;  %v576_v42 = vpop.f32.mrf.mxu2 }
  0xca   :  { %v560_v29 = vpop.f32.mrf.mxu1  ;;  %v547_v33 = vadd.f32 %v546_v28, %v533_v30 }
  0xcc   :  { %v561_v36 = vadd.f32 %v560_v29, %v547_v33 }
  0xce   :  { %v575_v40 = vadd.f32 %v574_v31, %v561_v36 }
  0xd0   :  { %v579_v44 = vmax.f32 %v575_v40, 0.0 }
  0xd1   :  { %v548_v37 = vpop.f32.mrf.mxu0 }
  0xd2   :  { %v549_v38 = vadd.f32 %v548_v37, %v535_v35  ;;  %v562_v39 = vpop.f32.mrf.mxu1 }
  0xd4   :  { %v563_v41 = vadd.f32 %v562_v39, %v549_v38 }
  0xd6   :  { %v577_v43 = vadd.f32 %v576_v42, %v563_v41 }
  0xd8   :  { %v580_v45 = vmax.f32 %v577_v43, 0.0 }
  0xda   :  { %v581_v46 = vpack.c.bf16 %v580_v45, %v579_v44 }
  0xdc   :  { %658 = vmatmul.bf16.vlgmr.msrb.gmra.mxu3 %v581_v46 }
 0x15f   :  { %v659_v50 = vpop.f32.mrf.mxu3 }
 0x160   :  { %v660_v52 = vadd.f32 %v1065_v51, %v659_v50 }
 0x162   :  { %v664_v55 = vmax.f32 %v660_v52, 0.0 }
 0x167   :  { %v661_v53 = vpop.f32.mrf.mxu3 }
 0x168   :  { %v662_v54 = vadd.f32 %v1065_v51, %v661_v53 }
 0x16a   :  { %v665_v56 = vmax.f32 %v662_v54, 0.0 }
 0x16c   :  { %v666_v57 = vpack.c.bf16 %v665_v56, %v664_v55 }
 0x16e   :  { %990 = vmatmul.msk.bf16.vlgmr.msra.gmra.mxu2 %vm703_vm1, %v666_v57 }
 0x1f1   :  { %v716_v58 = vpop.f32.mrf.mxu2 }
 0x1f2   :  { %v717_v61 = vadd.f32 %v1066_v59, %v716_v58 }
 0x1f9   :  { %v718_v60 = vpop.f32.mrf.mxu2 }
 0x1fa   :  { %v719_v62 = vadd.f32 %v1066_v59, %v718_v60 }
 0x1fc   :  { %v1055_v63 = vpack.c.bf16 %v719_v62, %v717_v61 }
 0x1fe   :  { %1056 = vst [vmem:[#allocation7] sm:$0xff] %v1055_v63  }
 0x1ff   :  { %737 = dma.vmem_to_hbm [thread:$0]  %s730_s18, 128, %s732_s4, [#allocation4], %s1149_s13, %s1149_s13, %s1150_s14  }
 0x200   :  { %1143 = dma.done.wait [#allocation4], 128  }
 0x201   :  { %1144 = vsyncadd [#allocation4], 4294967168 }
 0x202   :  { %742 = vsyncpa [#allocation3], 1 }
 0x203   :  { %743 = vsyncpa [#allocation6], 1 }
 0x204   :  { %744 = vsyncpa [#allocation4], 1 }

</bundles_post_ra>
